<compile_context>
chip_gen: v6e
topology: v6e:2x2x1
jax: 0.10.0
libtpu: 0.0.40
codegen_flags: <defaults>
</compile_context>

<pallas_src>
import functools

import jax
import jax.numpy as jnp
from jax.experimental import pallas as pl
from jax.experimental.pallas import tpu as pltpu


def _round_up(x, m):
    return ((x + m - 1) // m) * m


def _ceil_div(a, b):
    return -(-a // b)


# ---------------------------------------------------------------------------
# Pallas kernel: one MXU matmul does the entire s x s average pooling.
# ---------------------------------------------------------------------------
def _avg_pool_kernel(x_ref, p_ref, o_ref):
    # x_ref : (TILE, g*s*W)      -- g pooled rows per slab row, each stored as
    #                               its s contiguous input rows of width W
    # p_ref : (g*s*W, g*W_out)   -- block-diagonal pooling matrix (1/s^2 taps)
    # o_ref : (TILE, g*W_out)
    acc = jnp.dot(
        x_ref[...],
        p_ref[...],
        preferred_element_type=jnp.float32,
        precision=jax.lax.Precision.HIGHEST,   # keep f32 numerics exact
    )
    o_ref[...] = acc.astype(o_ref.dtype)


def _pool_matrix(width, scale, group, dtype):
    """Block-diagonal pooling matrix of shape (group*scale*width, group*(width//scale))."""
    w_out = width // scale
    in_col = jnp.arange(scale * width) % width            # column within its input row
    blk = (in_col[:, None] // scale) == jnp.arange(w_out)[None, :]
    blk = blk.astype(dtype) * (1.0 / float(scale * scale))  # (scale*width, w_out)
    return jnp.kron(jnp.eye(group, dtype=dtype), blk)        # block-diagonal


# ---------------------------------------------------------------------------
# Wrapper: layout plumbing (pure reshapes / zero-pad) + pallas_call
# ---------------------------------------------------------------------------
@functools.partial(jax.jit, static_argnames=("scale_factor", "tile_rows"))
def avg_pool2d(x, scale_factor=2, *, tile_rows=512):
    """F.avg_pool2d(x, kernel_size=s, stride=s, padding=0) for NCHW input."""
    s = int(scale_factor)
    n, c, h, w = x.shape
    h_out, w_out = h // s, w // s
    hc, wc = h_out * s, w_out * s                # ceil_mode=False -> drop remainder
    x = x[:, :, :hc, :wc]

    r = n * c * h_out                            # total number of pooled output rows
    # Pack `g` pooled rows per slab row so the kernel output is lane-dense (~128 lanes).
    g = max(1, min(_ceil_div(128, max(w_out, 1)), r))

    r_g = _ceil_div(r, g)                        # slab rows needed
    tile = max(8, min(tile_rows, _round_up(r_g, 8)))   # multiple of 8 sublanes
    grid = pl.cdiv(r_g, tile)
    rows_pad = grid * tile * g                   # pooled rows incl. zero padding

    # Contiguous reshape: each row = the s input rows feeding one pooled row.
    x2d = x.reshape(r, s * wc)
    if rows_pad != r:
        x2d = jnp.pad(x2d, ((0, rows_pad - r), (0, 0)))
    x2d = x2d.reshape(grid * tile, g * s * wc)

    pmat = _pool_matrix(wc, s, g, x.dtype)       # (g*s*wc, g*w_out), VMEM-resident

    out = pl.pallas_call(
        _avg_pool_kernel,
        out_shape=jax.ShapeDtypeStruct((grid * tile, g * w_out), x.dtype),
        grid_spec=pltpu.PrefetchScalarGridSpec(
            num_scalar_prefetch=0,
            grid=(grid,),
            in_specs=[
                pl.BlockSpec((tile, g * s * wc), lambda i: (i, 0)),
                pl.BlockSpec((g * s * wc, g * w_out), lambda i: (0, 0)),
            ],
            out_specs=pl.BlockSpec((tile, g * w_out), lambda i: (i, 0)),
        ),
        compiler_params=pltpu.CompilerParams(
            dimension_semantics=("parallel",),
        ),
    )(x2d, pmat)

    out = out.reshape(rows_pad, w_out)[:r]
    return out.reshape(n, c, h_out, w_out)


# ---------------------------------------------------------------------------
# Pure-JAX reference (correctness check only)
# ---------------------------------------------------------------------------
def avg_pool2d_reference(x, scale_factor=2):
    s = int(scale_factor)
    n, c, h, w = x.shape
    h_out, w_out = h // s, w // s
    xc = x[:, :, : h_out * s, : w_out * s]
    return xc.reshape(n, c, h_out, s, w_out, s).mean(axis=(3, 5))


if __name__ == "__main__":
    import numpy as np

    key = jax.random.PRNGKey(0)
    # NCHW, same convention as the PyTorch module.
    x = jax.random.normal(key, (2, 4, 16, 16), jnp.float32)

    out = avg_pool2d(x, scale_factor=2)
    out = jax.block_until_ready(out)

    ref = avg_pool2d_reference(x, scale_factor=2)
    assert out.shape == (2, 4, 8, 8)
    np.testing.assert_allclose(np.asarray(out), np.asarray(ref),
                               rtol=1e-4, atol=1e-4)
    print("KERNEL_OK")
</pallas_src>

<mosaic_0001>
module attributes {stable_mosaic.version = 11 : i64} {
  func.func @_avg_pool_kernel(%arg0: i32, %arg1: memref<8x512xf32, #tpu.memory_space<vmem>>, %arg2: memref<512x128xf32, #tpu.memory_space<vmem>>, %arg3: memref<8x128xf32, #tpu.memory_space<vmem>>) attributes {dimension_semantics = [#tpu.dimension_semantics<parallel>], iteration_bounds = array<i64: 1>, scalar_prefetch = 0 : i64, scratch_operands = 0 : i64, tpu.core_type = #tpu.core_type<tc>, window_params = [{transform_indices = @transform_0, window_bounds = array<i64: 8, 512>}, {pipeline_mode = #tpu.pipeline_mode<synchronous>, transform_indices = @transform_1, window_bounds = array<i64: 512, 128>}, {transform_indices = @transform_2, window_bounds = array<i64: 8, 128>}]} {
    %c0 = arith.constant 0 : index
    %c0_0 = arith.constant 0 : index
    %0 = vector.load %arg1[%c0, %c0_0] : memref<8x512xf32, #tpu.memory_space<vmem>>, vector<8x512xf32>
    %c0_1 = arith.constant 0 : index
    %c0_2 = arith.constant 0 : index
    %1 = vector.load %arg2[%c0_1, %c0_2] : memref<512x128xf32, #tpu.memory_space<vmem>>, vector<512x128xf32>
    %cst = arith.constant dense<0.000000e+00> : vector<8x128xf32>
    %2 = tpu.matmul %0, %1, %cst {dimension_numbers = #tpu.dot_dimension_numbers<[1], [0], [0], [1], [0, 0, 1, 1], [], []>, precision = #tpu.contract_precision<fp32>} : vector<8x512xf32>, vector<512x128xf32>, vector<8x128xf32> -> vector<8x128xf32>
    %c0_3 = arith.constant 0 : index
    %c0_4 = arith.constant 0 : index
    %3 = vector.load %arg3[%c0_3, %c0_4] : memref<8x128xf32, #tpu.memory_space<vmem>>, vector<8x128xf32>
    tpu.vector_store %arg3[%c0_3, %c0_4], %2 {strides = array<i32>} : memref<8x128xf32, #tpu.memory_space<vmem>>, vector<8x128xf32>,
    return
  }
  func.func @transform_0(%arg0: i32) -> (i32, i32) {
    %c0_i32 = arith.constant 0 : i32
    %c0_i32_0 = arith.constant 0 : i32
    return %arg0, %c0_i32 : i32, i32
  }
  func.func @transform_1(%arg0: i32) -> (i32, i32) {
    %c0_i32 = arith.constant 0 : i32
    %c0_i32_0 = arith.constant 0 : i32
    %c0_i32_1 = arith.constant 0 : i32
    return %c0_i32, %c0_i32_0 : i32, i32
  }
  func.func @transform_2(%arg0: i32) -> (i32, i32) {
    %c0_i32 = arith.constant 0 : i32
    %c0_i32_0 = arith.constant 0 : i32
    return %arg0, %c0_i32 : i32, i32
  }
}

</mosaic_0001>

<bundles_post_ra>
// kernel: avg_pool2d.1
= control target key start
LH: loop header
LB: loop body
LE: loop exit
PB: predicated region body
PF: predicated region fallthrough
CT: control target
= control target key end

     0   :  { %s3631_s1 = inlined_call_operand.vmem [shape: f32[512,128], index: 1, kind: input, shape index: {}]   ;;  %s3632_s0 = inlined_call_operand.vmem [shape: f32[8,512], index: 0, kind: input, shape index: {}]   ;;  %s3633_s2 = inlined_call_operand.vmem [shape: f32[8,128], index: 2, kind: output, shape index: {}]  }
   0x1   :  { %v46_v0 = vld [vmem:[%s3631_s1 + $0xf8] sm:$0xff]  ;;  %v45_v2 = vld [vmem:[%s3631_s1 + $0xf0] sm:$0xff]  ;;  %v44_v7 = vld [vmem:[%s3631_s1 + $0xe8] sm:$0xff] }
   0x2   :  { %v30_v1 = vld [vmem:[%s3631_s1 + $0x78] sm:$0xff]  ;;  %v2252_v3 = vand.u32 4294901760, %v46_v0  ;;  %v2256_v5 = vand.u32 4294901760, %v45_v2  ;;  %v29_v6 = vld [vmem:[%s3631_s1 + $0x70] sm:$0xff]  ;;  %v28_v8 = vld [vmem:[%s3631_s1 + $0x68] sm:$0xff]  ;;  %v2269_v10 = vand.u32 4294901760, %v44_v7 }
   0x3   :  { %v2254_v4 = vand.u32 4294901760, %v30_v1  ;;  %v2267_v9 = vand.u32 4294901760, %v29_v6  ;;  %v2271_v11 = vand.u32 4294901760, %v28_v8  ;;  %v43_v12 = vld [vmem:[%s3631_s1 + $0xe0] sm:$0xff]  ;;  %v42_v14 = vld [vmem:[%s3631_s1 + $0xd8] sm:$0xff]  ;;  %v2300_v20 = vld [vmem:[%s3631_s1 + $0xd0] sm:$0xff] }
   0x4   :  { %v27_v13 = vld [vmem:[%s3631_s1 + $0x60] sm:$0xff]  ;;  %1808 = vmatprep.subr.mxu0 %v2252_v3  ;;  %v2283_v15 = vand.u32 4294901760, %v43_v12  ;;  %v2287_v17 = vand.u32 4294901760, %v42_v14  ;;  %v2290_v18 = vsub.f32 %v46_v0, %v2252_v3  ;;  %v2295_v19 = vld [vmem:[%s3631_s1 + $0x58] sm:$0xff]  ;;  %v2305_v21 = vld [vmem:[%s3631_s1 + $0x50] sm:$0xff]  ;;  %v2315_v24 = vand.u32 4294901760, %v2300_v20 }
   0x5   :  { %v2285_v16 = vand.u32 4294901760, %v27_v13  ;;  %1809 = vmatpush3.msra.mxu0 %v2254_v4  ;;  %v2309_v22 = vand.u32 4294901760, %v2295_v19  ;;  %v2312_v23 = vsub.f32 %v30_v1, %v2254_v4  ;;  %v2318_v25 = vsub.f32 %v45_v2, %v2256_v5  ;;  %v2323_v26 = vld [vmem:[%s3631_s1 + $0xc8] sm:$0xff]  ;;  %v2333_v28 = vld [vmem:[%s3631_s1 + $0xc0] sm:$0xff]  ;;  %v2385_v46 = vld [vmem:[%s3631_s1 + $0xb8] sm:$0xff] }
   0x6   :  { %v2328_v27 = vld [vmem:[%s3631_s1 + $0x48] sm:$0xff]  ;;  %1810 = vmatprep.subr.mxu0 %v2256_v5  ;;  %v3647_v29 = vand.u32 4294901760, %v2290_v18  ;;  %v2338_v30 = vand.u32 4294901760, %v2305_v21  ;;  %v2341_v31 = vsub.f32 %v29_v6, %v2267_v9  ;;  %v2344_v32 = vand.u32 4294901760, %v2323_v26  ;;  %v2358_v37 = vld [vmem:[%s3631_s1 + $0x40] sm:$0xff]  ;;  %v2398_v51 = vld [vmem:[%s3631_s1 + $0x38] sm:$0xff] }
   0x7   :  { %1811 = vmatpush3.msra.mxu0 %v2267_v9  ;;  %v3646_v33 = vand.u32 4294901760, %v2312_v23  ;;  %v3644_v34 = vand.u32 4294901760, %v2318_v25  ;;  %v2350_v35 = vsub.f32 %v44_v7, %v2269_v10  ;;  %v2353_v36 = vand.u32 4294901760, %v2328_v27  ;;  %v2408_v56 = vld [vmem:[%s3631_s1 + $0xb0] sm:$0xff]  ;;  %v2438_v2 = vld [vmem:[%s3631_s1 + $0xa8] sm:$0xff] }
   0x8   :  { %3771 = vst [vmem:[#allocation2_spill] sm:$0xff] %v2338_v30  ;;  %3772 = vst [vmem:[#allocation3_spill] sm:$0xff] %v2344_v32  ;;  %1812 = vmatprep.subr.mxu0 %v2269_v10  ;;  %v307_v38 = vsub.f32 %v2290_v18, %v3647_v29  ;;  %v3643_v39 = vand.u32 4294901760, %v2341_v31  ;;  %v2366_v40 = vsub.f32 %v28_v8, %v2271_v11  ;;  %v2369_v41 = vand.u32 4294901760, %v2333_v28  ;;  %v2423_v61 = vld [vmem:[%s3631_s1 + $0x30] sm:$0xff] }
   0x9   :  { %3773 = vst [vmem:[#allocation4_spill] sm:$0xff] %v2353_v36  ;;  %1813 = vmatpush3.msra.mxu0 %v2271_v11  ;;  %v195_v42 = vsub.f32 %v2312_v23, %v3646_v33  ;;  %v314_v43 = vsub.f32 %v2318_v25, %v3644_v34  ;;  %v3641_v44 = vand.u32 4294901760, %v2350_v35  ;;  %v2380_v45 = vsub.f32 %v43_v12, %v2283_v15  ;;  %v2574_v33 = vld [vmem:[%s3631_s1 + $0x88] sm:$0xff] }
   0xa   :  { %3774 = vst [vmem:[#allocation5_spill] sm:$0xff] %v2369_v41  ;;  %1814 = vmatprep.subr.mxu0 %v2283_v15  ;;  %v308_v47 = vand.u32 4294901760, %v307_v38  ;;  %v202_v48 = vsub.f32 %v2341_v31, %v3643_v39  ;;  %v3639_v49 = vand.u32 4294901760, %v2366_v40  ;;  %v2393_v50 = vand.u32 4294901760, %v2358_v37 }
   0xb   :  { %1815 = vmatpush3.msra.mxu0 %v2285_v16  ;;  %v196_v52 = vand.u32 4294901760, %v195_v42  ;;  %v315_v53 = vand.u32 4294901760, %v314_v43  ;;  %v321_v54 = vsub.f32 %v2350_v35, %v3641_v44  ;;  %v3638_v55 = vand.u32 4294901760, %v2380_v45  ;;  %v2547_v44 = vld [vmem:[%s3631_s1 + $0x90] sm:$0xff] }
   0xc   :  { %3775 = vst [vmem:[#allocation6_spill] sm:$0xff] %v2393_v50  ;;  %1816 = vmatprep.subr.mxu0 %v2287_v17  ;;  %1843 = vmatprep.subr.mxu1 %v308_v47  ;;  %v203_v57 = vand.u32 4294901760, %v202_v48  ;;  %v209_v58 = vsub.f32 %v2366_v40, %v3639_v49  ;;  %v2415_v59 = vsub.f32 %v27_v13, %v2285_v16  ;;  %v2418_v60 = vand.u32 4294901760, %v2385_v46  ;;  %v2452_v13 = vld [vmem:[%s3631_s1 + $0x28] sm:$0xff]  ;;  %v2531_v49 = vld [vmem:[%s3631_s1 + $0x18] sm:$0xff] }
   0xd   :  { %1817 = vmatpush3.msra.mxu0 %v2309_v22  ;;  %1844 = vmatpush3.msra.mxu1 %v196_v52  ;;  %v322_v62 = vand.u32 4294901760, %v321_v54  ;;  %v328_v63 = vsub.f32 %v2380_v45, %v3638_v55  ;;  %v2430_v0 = vsub.f32 %v42_v14, %v2287_v17  ;;  %v2433_v1 = vand.u32 4294901760, %v2398_v51 }
   0xe   :  { %3776 = vst [vmem:[#allocation7_spill] sm:$0xff] %v2418_v60  ;;  %1818 = vmatprep.subr.mxu0 %v2315_v24  ;;  %1845 = vmatprep.subr.mxu1 %v315_v53  ;;  %v210_v6 = vand.u32 4294901760, %v209_v58  ;;  %v3636_v7 = vand.u32 4294901760, %v2415_v59  ;;  %v2444_v8 = vsub.f32 %v2295_v19, %v2309_v22  ;;  %v2447_v12 = vand.u32 4294901760, %v2408_v56 }
   0xf   :  { %3777 = vst [vmem:[#allocation8_spill] sm:$0xff] %v2433_v1  ;;  %1819 = vmatpush3.msra.mxu0 %v2338_v30  ;;  %1846 = vmatpush3.msra.mxu1 %v203_v57  ;;  %v329_v14 = vand.u32 4294901760, %v328_v63  ;;  %v3634_v38 = vand.u32 4294901760, %v2430_v0  ;;  %v2458_v42 = vsub.f32 %v2300_v20, %v2315_v24  ;;  %v2461_v19 = vand.u32 4294901760, %v2423_v61  ;;  %v2478_v20 = vld [vmem:[%s3631_s1 + $0xa0] sm:$0xff] }
  0x10   :  { %3778 = vst [vmem:[#allocation9_spill] sm:$0xff] %v2447_v12  ;;  %1820 = vmatprep.subr.mxu0 %v2344_v32  ;;  %1847 = vmatprep.subr.mxu1 %v322_v62  ;;  %v216_v43 = vsub.f32 %v2415_v59, %v3636_v7  ;;  %v3635_v47 = vand.u32 4294901760, %v2444_v8  ;;  %v2470_v48 = vsub.f32 %v2305_v21, %v2338_v30  ;;  %v2473_v52 = vand.u32 4294901760, %v2438_v2 }
  0x11   :  { %3779 = vst [vmem:[#allocation10_spill] sm:$0xff] %v2461_v19  ;;  %1821 = vmatpush3.msra.mxu0 %v2353_v36  ;;  %1848 = vmatpush3.msra.mxu1 %v210_v6  ;;  %v335_v53 = vsub.f32 %v2430_v0, %v3634_v38  ;;  %v3637_v54 = vand.u32 4294901760, %v2458_v42  ;;  %v2487_v21 = vsub.f32 %v2323_v26, %v2344_v32  ;;  %v2490_v57 = vand.u32 4294901760, %v2452_v13  ;;  %v2504_v26 = vld [vmem:[%s3631_s1 + $0x20] sm:$0xff] }
  0x12   :  { %3780 = vst [vmem:[#allocation11_spill] sm:$0xff] %v2473_v52  ;;  %1822 = vmatprep.subr.mxu0 %v2369_v41  ;;  %1849 = vmatprep.subr.mxu1 %v329_v14  ;;  %v217_v58 = vand.u32 4294901760, %v216_v43  ;;  %v223_v62 = vsub.f32 %v2444_v8, %v3635_v47  ;;  %v3640_v63 = vand.u32 4294901760, %v2470_v48  ;;  %v2499_v6 = vsub.f32 %v2328_v27, %v2353_v36  ;;  %v2517_v27 = vld [vmem:[%s3631_s1 + $0x98] sm:$0xff] }
  0x13   :  { %3781 = vst [vmem:[#allocation12_spill] sm:$0xff] %v2490_v57  ;;  %1823 = vmatpush3.msra.mxu0 %v2393_v50  ;;  %v336_v38 = vand.u32 4294901760, %v335_v53  ;;  %v342_v14 = vsub.f32 %v2458_v42, %v3637_v54  ;;  %v3642_v43 = vand.u32 4294901760, %v2487_v21  ;;  %v2512_v47 = vand.u32 4294901760, %v2478_v20 }
  0x14   :  { %1850 = vmatpush3.msra.mxu1 %v217_v58  ;;  %1824 = vmatprep.subr.mxu0 %v2418_v60  ;;  %v224_v7 = vand.u32 4294901760, %v223_v62  ;;  %v230_v53 = vsub.f32 %v2470_v48, %v3640_v63  ;;  %v3645_v54 = vand.u32 4294901760, %v2499_v6  ;;  %v2526_v55 = vsub.f32 %v2333_v28, %v2369_v41  ;;  %v11_v41 = vld [vmem:[%s3632_s0] sm:$0xff] }
  0x15   :  { %3782 = vst [vmem:[#allocation13_spill] sm:$0xff] %v2512_v47  ;;  %1851 = vmatprep.subr.mxu1 %v336_v38  ;;  %1825 = vmatpush3.msra.mxu0 %v2433_v1  ;;  %v343_v58 = vand.u32 4294901760, %v342_v14  ;;  %v349_v62 = vsub.f32 %v2487_v21, %v3642_v43  ;;  %v2538_v63 = vand.u32 4294901760, %v2504_v26  ;;  %v2542_v28 = vsub.f32 %v2358_v37, %v2393_v50  ;;  %v2560_v37 = vld [vmem:[%s3631_s1 + $0x10] sm:$0xff] }
  0x16   :  { %1852 = vmatpush3.msra.mxu1 %v224_v7  ;;  %1826 = vmatprep.subr.mxu0 %v2447_v12  ;;  %v231_v38 = vand.u32 4294901760, %v230_v53  ;;  %v237_v14 = vsub.f32 %v2499_v6, %v3645_v54  ;;  %v3650_v43 = vand.u32 4294901760, %v2526_v55  ;;  %v2555_v39 = vand.u32 4294901760, %v2517_v27 }
  0x17   :  { %3783 = vst [vmem:[#allocation14_spill] sm:$0xff] %v2538_v63  ;;  %1853 = vmatprep.subr.mxu1 %v343_v58  ;;  %1827 = vmatpush3.msra.mxu0 %v2461_v19  ;;  %v350_v7 = vand.u32 4294901760, %v349_v62  ;;  %v3651_v53 = vand.u32 4294901760, %v2542_v28  ;;  %v2566_v34 = vsub.f32 %v2385_v46, %v2418_v60  ;;  %v2569_v54 = vand.u32 4294901760, %v2531_v49 }
  0x18   :  { %1854 = vmatpush3.msra.mxu1 %v231_v38  ;;  %1828 = vmatprep.subr.mxu0 %v2473_v52  ;;  %v238_v58 = vand.u32 4294901760, %v237_v14  ;;  %v356_v62 = vsub.f32 %v2526_v55, %v3650_v43  ;;  %v2582_v46 = vsub.f32 %v2398_v51, %v2433_v1  ;;  %v2585_v29 = vand.u32 4294901760, %v2547_v44  ;;  %v2602_v51 = vld [vmem:[%s3631_s1 + $0x8] sm:$0xff] }
  0x19   :  { %3784 = vst [vmem:[#allocation15_spill] sm:$0xff] %v2569_v54  ;;  %1855 = vmatprep.subr.mxu1 %v350_v7  ;;  %1829 = vmatpush3.msra.mxu0 %v2490_v57  ;;  %v244_v38 = vsub.f32 %v2542_v28, %v3651_v53  ;;  %v2594_v60 = vsub.f32 %v2408_v56, %v2447_v12  ;;  %v2597_v43 = vand.u32 4294901760, %v2560_v37  ;;  %v2611_v56 = vand.u32 4294901760, %v2574_v33  ;;  %v2616_v12 = vld [vmem:[%s3631_s1 + $0x80] sm:$0xff] }
  0x1a   :  { %3785 = vst [vmem:[#allocation16_spill] sm:$0xff] %v2585_v29  ;;  %1856 = vmatpush3.msra.mxu1 %v238_v58  ;;  %1830 = vmatprep.subr.mxu0 %v2512_v47  ;;  %v357_v7 = vand.u32 4294901760, %v356_v62  ;;  %v2608_v14 = vsub.f32 %v2423_v61, %v2461_v19  ;;  %v3789_v1 = vand.u32 4294901760, %v2566_v34  ;;  %v2625_v61 = vsub.f32 %v2438_v2, %v2473_v52  ;;  %v2642_v2 = vld [vmem:[%s3631_s1] sm:$0xff] }
  0x1b   :  { %3786 = vst [vmem:[#allocation17_spill] sm:$0xff] %v2597_v43  ;;  %3788 = vst [vmem:[#allocation19_spill] sm:$0xff] %v2611_v56  ;;  %1831 = vmatpush3.msra.mxu0 %v2538_v63  ;;  %v245_v58 = vand.u32 4294901760, %v244_v38  ;;  %v3668_v53 = vand.u32 4294901760, %v2594_v60  ;;  %v3791_v19 = vand.u32 4294901760, %v2582_v46  ;;  %v2633_v38 = vand.u32 4294901760, %v2602_v51 }
  0x1c   :  { %3787 = vst [vmem:[#allocation18_spill] sm:$0xff] %v2608_v14  ;;  %v363_v62 = vsub.f32 %v2566_v34, %v3789_v1  ;;  %3790 = vst [vmem:[#allocation20_spill] sm:$0xff] %v2625_v61  ;;  %1857 = vmatprep.subr.mxu1 %v357_v7  ;;  %1832 = vmatprep.subr.mxu0 %v2555_v39  ;;  %v2637_v1 = vsub.f32 %v2452_v13, %v2490_v57  ;;  %v2650_v52 = vand.u32 4294901760, %v2616_v12  ;;  %v12_v13 = vld [vmem:[%s3632_s0 + $0x8] sm:$0xff] }
  0x1d   :  { %v251_v50 = vsub.f32 %v2582_v46, %v3791_v19  ;;  %1858 = vmatpush3.msra.mxu1 %v245_v58  ;;  %1833 = vmatpush3.msra.mxu0 %v2569_v54  ;;  %v370_v19 = vsub.f32 %v2594_v60, %v3668_v53  ;;  %v3792_v58 = vand.u32 4294901760, %v2608_v14  ;;  %v2662_v53 = vsub.f32 %v2478_v20, %v2512_v47 }
  0x1e   :  { %v364_v7 = vand.u32 4294901760, %v363_v62  ;;  %1834 = vmatprep.subr.mxu0 %v2585_v29  ;;  %v2676_v36 = vsub.f32 %v2504_v26, %v2538_v63  ;;  %v2691_v26 = vand.u32 4294901760, %v11_v41 }
  0x1f   :  { %v252_v57 = vand.u32 4294901760, %v251_v50  ;;  %v258_v62 = vsub.f32 %v2608_v14, %v3792_v58  ;;  %v371_v32 = vand.u32 4294901760, %v370_v19  ;;  %1835 = vmatpush3.msra.mxu0 %v2597_v43  ;;  %v3793_v50 = vand.u32 4294901760, %v2625_v61 }
  0x20   :  { %1859 = vmatprep.subr.mxu1 %v364_v7  ;;  %v2672_v58 = vand.u32 4294901760, %v2642_v2  ;;  %1836 = vmatprep.subr.mxu0 %v2611_v56  ;;  %v3794_v7 = vand.u32 4294901760, %v2637_v1  ;;  %v3679_v47 = vand.u32 4294901760, %v2662_v53  ;;  %v2683_v14 = vand.u32 4294901760, %v12_v13  ;;  %3796 = vst [vmem:[#allocation22_spill] sm:$0xff] %v2691_v26 }
  0x21   :  { %v377_v30 = vsub.f32 %v2625_v61, %v3793_v50  ;;  %1860 = vmatpush3.msra.mxu1 %v252_v57  ;;  %v259_v20 = vand.u32 4294901760, %v258_v62  ;;  %1837 = vmatpush3.msra.mxu0 %v2633_v38  ;;  %v3680_v61 = vand.u32 4294901760, %v2676_v36  ;;  %v2689_v57 = vsub.f32 %v2517_v27, %v2555_v39 }
  0x22   :  { %v265_v19 = vsub.f32 %v2637_v1, %v3794_v7  ;;  %3795 = vst [vmem:[#allocation21_spill] sm:$0xff] %v2683_v14  ;;  %1861 = vmatprep.subr.mxu1 %v371_v32  ;;  %1838 = vmatprep.subr.mxu0 %v2650_v52  ;;  %v384_v7 = vsub.f32 %v2662_v53, %v3679_v47 }
  0x23   :  { %v378_v50 = vand.u32 4294901760, %v377_v30  ;;  %1862 = vmatpush3.msra.mxu1 %v259_v20  ;;  %v2698_v30 = vsub.f32 %v12_v13, %v2683_v14  ;;  %v2702_v32 = vsub.f32 %v2531_v49, %v2569_v54  ;;  %1839 = vmatpush3.msra.mxu0 %v2672_v58  ;;  %v272_v27 = vsub.f32 %v2676_v36, %v3680_v61 }
  0x24   :  { %v266_v62 = vand.u32 4294901760, %v265_v19  ;;  %v2710_v19 = vsub.f32 %v11_v41, %v2691_v26  ;;  %v2714_v13 = vsub.f32 %v2547_v44, %v2585_v29  ;;  %v385_v47 = vand.u32 4294901760, %v384_v7  ;;  %1878 = vmatprep.subr.mxu0 %v2290_v18  ;;  %416 = vmatprep.mubr.f32.mxu1 %v2683_v14 }
  0x25   :  { %1863 = vmatprep.subr.mxu1 %v378_v50  ;;  %v3685_v49 = vand.u32 4294901760, %v2698_v30  ;;  %v3688_v50 = vand.u32 4294901760, %v2702_v32  ;;  %v2721_v61 = vsub.f32 %v2560_v37, %v2597_v43  ;;  %v273_v20 = vand.u32 4294901760, %v272_v27 }
  0x26   :  { %1864 = vmatpush3.msra.mxu1 %v266_v62  ;;  %v3797_v41 = vand.u32 4294901760, %v2689_v57  ;;  %v3798_v62 = vand.u32 4294901760, %v2710_v19  ;;  %v3799_v14 = vand.u32 4294901760, %v2714_v13  ;;  %v2748_v43 = vsub.f32 %v2602_v51, %v2633_v38 }
  0x27   :  { %1865 = vmatprep.subr.mxu1 %v385_v47  ;;  %v178_v7 = vsub.f32 %v2698_v30, %v3685_v49  ;;  %v279_v37 = vsub.f32 %v2702_v32, %v3688_v50  ;;  %v3801_v29 = vand.u32 4294901760, %v2721_v61 }
  0x28   :  { %v391_v54 = vsub.f32 %v2689_v57, %v3797_v41  ;;  %v2738_v41 = vsub.f32 %v2574_v33, %v2611_v56  ;;  %1866 = vmatpush3.msra.mxu1 %v273_v20  ;;  %v184_v47 = vsub.f32 %v2710_v19, %v3798_v62  ;;  %v398_v49 = vsub.f32 %v2714_v13, %v3799_v14 }
  0x29   :  { %3800 = vst [vmem:[#allocation23_spill] sm:$0xff] %v2748_v43  ;;  %v179_v50 = vand.u32 4294901760, %v178_v7  ;;  %v280_v27 = vand.u32 4294901760, %v279_v37  ;;  %v286_v33 = vsub.f32 %v2721_v61, %v3801_v29  ;;  %v3695_v62 = vand.u32 4294901760, %v2748_v43 }
  0x2a   :  { %v392_v44 = vand.u32 4294901760, %v391_v54  ;;  %v3696_v54 = vand.u32 4294901760, %v2738_v41  ;;  %v185_v20 = vand.u32 4294901760, %v184_v47  ;;  %v399_v56 = vand.u32 4294901760, %v398_v49 }
  0x2b   :  { %v2757_v14 = vsub.f32 %v2616_v12, %v2650_v52  ;;  %180 = vmatprep.mubr.f32.mxu0 %v179_v50  ;;  %v287_v51 = vand.u32 4294901760, %v286_v33  ;;  %v2764_v29 = vsub.f32 %v2642_v2, %v2672_v58  ;;  %v293_v49 = vsub.f32 %v2748_v43, %v3695_v62  ;;  %v3804_v33 = vld [vmem:[#allocation18_spill] sm:$0xff]  ;;  %v3817_v62 = vld [vmem:[#allocation13_spill] sm:$0xff] }
  0x2c   :  { %1867 = vmatprep.subr.mxu1 %v392_v44  ;;  %v405_v7 = vsub.f32 %v2738_v41, %v3696_v54  ;;  %186 = vmatmul.mubr.f32.vlgmr.msra.gmra.mxu0 %v185_v20  ;;  %v3805_v20 = vld [vmem:[#allocation2_spill] sm:$0xff]  ;;  %v3818_v54 = vand.u32 4294901760, %v2290_v18  ;;  %v3826_v18 = vand.u32 4294901760, %v2350_v35 }
  0x2d   :  { %3802 = vst [vmem:[#allocation24_spill] sm:$0xff] %v2757_v14  ;;  %1868 = vmatpush3.msra.mxu1 %v280_v27  ;;  %3803 = vst [vmem:[#allocation25_spill] sm:$0xff] %v2764_v29  ;;  %v3694_v12 = vand.u32 4294901760, %v2757_v14  ;;  %1879 = vmatpush3.msra.mxu0 %v2312_v23  ;;  %v3693_v44 = vand.u32 4294901760, %v2764_v29  ;;  %v294_v37 = vand.u32 4294901760, %v293_v49  ;;  %v3808_v49 = vld [vmem:[#allocation4_spill] sm:$0xff] }
  0x2e   :  { %1869 = vmatprep.subr.mxu1 %v399_v56  ;;  %v406_v50 = vand.u32 4294901760, %v405_v7  ;;  %1880 = vmatprep.subr.mxu0 %v2318_v25  ;;  %v3807_v7 = vld [vmem:[#allocation3_spill] sm:$0xff] }
  0x2f   :  { %1870 = vmatpush3.msra.mxu1 %v287_v51  ;;  %v412_v2 = vsub.f32 %v2757_v14, %v3694_v12  ;;  %553 = vmatprep.mubr.f32.mxu0 %v2698_v30  ;;  %v300_v56 = vsub.f32 %v2764_v29, %v3693_v44  ;;  %v3806_v51 = vld [vmem:[#allocation20_spill] sm:$0xff]  ;;  %v3815_v44 = vld [vmem:[#allocation11_spill] sm:$0xff] }
  0x30   :  { %1881 = vmatpush3.msra.mxu0 %v2341_v31  ;;  %1871 = vmatprep.subr.mxu1 %v406_v50  ;;  %v3809_v50 = vld [vmem:[#allocation5_spill] sm:$0xff]  ;;  %v3816_v12 = vld [vmem:[#allocation12_spill] sm:$0xff] }
  0x31   :  { %1882 = vmatprep.subr.mxu0 %v2350_v35  ;;  %1872 = vmatpush3.msra.mxu1 %v294_v37  ;;  %v413_v27 = vand.u32 4294901760, %v412_v2  ;;  %v301_v47 = vand.u32 4294901760, %v300_v56  ;;  %v3810_v37 = vld [vmem:[#allocation6_spill] sm:$0xff]  ;;  %v3811_v2 = vld [vmem:[#allocation7_spill] sm:$0xff]  ;;  %v3812_v56 = vld [vmem:[#allocation8_spill] sm:$0xff]  ;;  %v3831_v35 = vand.u32 4294901760, %v2710_v19 }
  0x32   :  { %1883 = vmatpush3.msra.mxu0 %v2366_v40 }
  0x33   :  { %1873 = vmatprep.subr.mxu1 %v413_v27  ;;  %1884 = vmatprep.subr.mxu0 %v2380_v45  ;;  %v3813_v27 = vld [vmem:[#allocation9_spill] sm:$0xff] }
  0x34   :  { %1874 = vmatpush3.msra.mxu1 %v301_v47  ;;  %1885 = vmatpush3.msra.mxu0 %v2415_v59  ;;  %v3814_v47 = vld [vmem:[#allocation10_spill] sm:$0xff] }
  0x35   :  { %418 = vmatmul.mubr.f32.vlgmr.msra.gmra.mxu1 %v2691_v26  ;;  %1886 = vmatprep.subr.mxu0 %v2430_v0  ;;  %v3819_v26 = vld [vmem:[#allocation15_spill] sm:$0xff] }
  0x36   :  { %1913 = vmatprep.subr.mxu1 %v2252_v3  ;;  %1887 = vmatpush3.msra.mxu0 %v2444_v8 }
  0x37   :  { %1914 = vmatpush3.msra.mxu1 %v2254_v4  ;;  %1888 = vmatprep.subr.mxu0 %v2458_v42 }
  0x38   :  { %1915 = vmatprep.subr.mxu1 %v2256_v5  ;;  %1889 = vmatpush3.msra.mxu0 %v2470_v48 }
  0x39   :  { %1916 = vmatpush3.msra.mxu1 %v2267_v9  ;;  %1890 = vmatprep.subr.mxu0 %v2487_v21 }
  0x3a   :  { %1917 = vmatprep.subr.mxu1 %v2269_v10  ;;  %1891 = vmatpush3.msra.mxu0 %v2499_v6 }
  0x3b   :  { %1918 = vmatpush3.msra.mxu1 %v2271_v11  ;;  %1892 = vmatprep.subr.mxu0 %v2526_v55 }
  0x3c   :  { %1919 = vmatprep.subr.mxu1 %v2283_v15  ;;  %1893 = vmatpush3.msra.mxu0 %v2542_v28 }
  0x3d   :  { %1920 = vmatpush3.msra.mxu1 %v2285_v16  ;;  %1894 = vmatprep.subr.mxu0 %v2566_v34 }
  0x3e   :  { %1921 = vmatprep.subr.mxu1 %v2287_v17  ;;  %1895 = vmatpush3.msra.mxu0 %v2582_v46 }
  0x3f   :  { %1922 = vmatpush3.msra.mxu1 %v2309_v22  ;;  %1896 = vmatprep.subr.mxu0 %v2594_v60 }
  0x40   :  { %1923 = vmatprep.subr.mxu1 %v2315_v24  ;;  %1897 = vmatpush3.msra.mxu0 %v3804_v33 }
  0x41   :  { %1924 = vmatpush3.msra.mxu1 %v3805_v20  ;;  %1898 = vmatprep.subr.mxu0 %v3806_v51 }
  0x42   :  { %1925 = vmatprep.subr.mxu1 %v3807_v7  ;;  %1899 = vmatpush3.msra.mxu0 %v2637_v1 }
  0x43   :  { %1926 = vmatpush3.msra.mxu1 %v3808_v49  ;;  %1900 = vmatprep.subr.mxu0 %v2662_v53 }
  0x44   :  { %1927 = vmatprep.subr.mxu1 %v3809_v50  ;;  %1901 = vmatpush3.msra.mxu0 %v2676_v36 }
  0x45   :  { %1928 = vmatpush3.msra.mxu1 %v3810_v37  ;;  %1902 = vmatprep.subr.mxu0 %v2689_v57 }
  0x46   :  { %1929 = vmatprep.subr.mxu1 %v3811_v2  ;;  %1903 = vmatpush3.msra.mxu0 %v2702_v32 }
  0x47   :  { %1930 = vmatpush3.msra.mxu1 %v3812_v56  ;;  %1904 = vmatprep.subr.mxu0 %v2714_v13 }
  0x48   :  { %1931 = vmatprep.subr.mxu1 %v3813_v27  ;;  %1905 = vmatpush3.msra.mxu0 %v2721_v61 }
  0x49   :  { %1932 = vmatpush3.msra.mxu1 %v3814_v47  ;;  %1906 = vmatprep.subr.mxu0 %v2738_v41 }
  0x4a   :  { %1933 = vmatprep.subr.mxu1 %v3815_v44  ;;  %1907 = vmatpush3.msra.mxu0 %v2748_v43  ;;  %v3820_v43 = vand.u32 4294901760, %v2312_v23  ;;  %v3827_v23 = vand.u32 4294901760, %v2366_v40  ;;  %v3833_v40 = vand.u32 4294901760, %v2444_v8  ;;  %v3839_v8 = vand.u32 4294901760, %v2542_v28 }
  0x4b   :  { %1934 = vmatpush3.msra.mxu1 %v3816_v12  ;;  %1908 = vmatprep.subr.mxu0 %v2757_v14  ;;  %v3821_v12 = vld [vmem:[#allocation16_spill] sm:$0xff]  ;;  %v3825_v14 = vld [vmem:[#allocation19_spill] sm:$0xff] }
  0x4c   :  { %1935 = vmatprep.subr.mxu1 %v3817_v62  ;;  %1909 = vmatpush3.msra.mxu0 %v2764_v29  ;;  %v3822_v62 = vand.u32 4294901760, %v2318_v25  ;;  %v3823_v29 = vld [vmem:[#allocation17_spill] sm:$0xff]  ;;  %v3828_v25 = vand.u32 4294901760, %v2380_v45  ;;  %v3834_v45 = vand.u32 4294901760, %v2458_v42 }
  0x4d   :  { %1936 = vmatpush3.msra.mxu1 %v2538_v63  ;;  %556 = vmatmul.mubr.f32.vlgmr.msra.gmra.mxu0 %v2710_v19  ;;  %v3824_v63 = vand.u32 4294901760, %v2341_v31  ;;  %v3829_v31 = vand.u32 4294901760, %v2698_v30  ;;  %v3845_v30 = vand.u32 4294901760, %v3806_v51 }
  0x4e   :  { %1937 = vmatprep.subr.mxu1 %v2555_v39  ;;  %1948 = vmatprep.subr.mxu0 %v3818_v54  ;;  %v3847_v54 = vand.u32 4294901760, %v2637_v1 }
  0x4f   :  { %1938 = vmatpush3.msra.mxu1 %v3819_v26  ;;  %1949 = vmatpush3.msra.mxu0 %v3820_v43  ;;  %v3832_v43 = vand.u32 4294901760, %v2430_v0  ;;  %v3836_v0 = vand.u32 4294901760, %v2487_v21  ;;  %v3841_v21 = vand.u32 4294901760, %v2582_v46 }
  0x50   :  { %1939 = vmatprep.subr.mxu1 %v3821_v12  ;;  %1950 = vmatprep.subr.mxu0 %v3822_v62 }
  0x51   :  { %1940 = vmatpush3.msra.mxu1 %v3823_v29  ;;  %1951 = vmatpush3.msra.mxu0 %v3824_v63  ;;  %v3830_v63 = vand.u32 4294901760, %v2415_v59  ;;  %v3835_v59 = vand.u32 4294901760, %v2470_v48  ;;  %v60_v48 = vld [vmem:[%s3631_s1 + $0x168] sm:$0xff] }
  0x52   :  { %1941 = vmatprep.subr.mxu1 %v3825_v14  ;;  %1952 = vmatprep.subr.mxu0 %v3826_v18  ;;  %v2925_v46 = vand.u32 4294901760, %v60_v48  ;;  %v3851_v18 = vand.u32 4294901760, %v2689_v57 }
  0x53   :  { %1942 = vmatpush3.msra.mxu1 %v2633_v38  ;;  %1953 = vmatpush3.msra.mxu0 %v3827_v23  ;;  %v57_v23 = vld [vmem:[%s3631_s1 + $0x150] sm:$0xff] }
  0x54   :  { %1943 = vmatprep.subr.mxu1 %v2650_v52  ;;  %1954 = vmatprep.subr.mxu0 %v3828_v25  ;;  %3844 = vst [vmem:[#allocation18_spill] sm:$0xff] %v2925_v46  ;;  %v2959_v1 = vsub.f32 %v60_v48, %v2925_v46  ;;  %v3866_v48 = vld [vmem:[#allocation13_spill] sm:$0xff] }
  0x55   :  { %1944 = vmatpush3.msra.mxu1 %v2672_v58  ;;  %660 = vmatprep.mubr.f32.mxu1 %v3829_v31  ;;  %v3852_v31 = vand.u32 4294901760, %v2702_v32 }
  0x56   :  { %1955 = vmatpush3.msra.mxu0 %v3830_v63  ;;  %664 = vmatmul.mubr.f32.vlgmr.msra.gmra.mxu1 %v3831_v35  ;;  %v3854_v35 = vand.u32 4294901760, %v2714_v13  ;;  %v56_v13 = vld [vmem:[%s3631_s1 + $0x148] sm:$0xff] }
  0x57   :  { %1956 = vmatprep.subr.mxu0 %v3832_v43  ;;  %1983 = vmatprep.subr.mxu1 %v2252_v3  ;;  %v3837_v3 = vand.u32 4294901760, %v2499_v6  ;;  %v3843_v6 = vand.u32 4294901760, %v3804_v33  ;;  %v3848_v33 = vand.u32 4294901760, %v2662_v53  ;;  %v74_v53 = vld [vmem:[%s3631_s1 + $0x1d8] sm:$0xff] }
  0x58   :  { %1957 = vmatpush3.msra.mxu0 %v3833_v40  ;;  %1984 = vmatpush3.msra.mxu1 %v2254_v4  ;;  %v78_v4 = vld [vmem:[%s3631_s1 + $0x1f8] sm:$0xff]  ;;  %v2996_v32 = vand.u32 4294901760, %v74_v53 }
  0x59   :  { %1958 = vmatprep.subr.mxu0 %v3834_v45  ;;  %1985 = vmatprep.subr.mxu1 %v2256_v5  ;;  %v62_v5 = vld [vmem:[%s3631_s1 + $0x178] sm:$0xff]  ;;  %v2899_v42 = vand.u32 4294901760, %v78_v4 }
  0x5a   :  { %1959 = vmatpush3.msra.mxu0 %v3835_v59  ;;  %1986 = vmatpush3.msra.mxu1 %v2267_v9  ;;  %v3838_v9 = vand.u32 4294901760, %v2526_v55  ;;  %v2901_v55 = vand.u32 4294901760, %v62_v5  ;;  %3855 = vst [vmem:[#allocation4_spill] sm:$0xff] %v2996_v32  ;;  %v3004_v59 = vand.u32 4294901760, %v57_v23 }
  0x5b   :  { %1960 = vmatprep.subr.mxu0 %v3836_v0  ;;  %1987 = vmatprep.subr.mxu1 %v2269_v10  ;;  %v61_v10 = vld [vmem:[%s3631_s1 + $0x170] sm:$0xff]  ;;  %v2939_v19 = vsub.f32 %v78_v4, %v2899_v42  ;;  %v3859_v0 = vand.u32 4294901760, %v2738_v41  ;;  %v72_v4 = vld [vmem:[%s3631_s1 + $0x1c8] sm:$0xff] }
  0x5c   :  { %1961 = vmatpush3.msra.mxu0 %v3837_v3  ;;  %1988 = vmatpush3.msra.mxu1 %v2271_v11  ;;  %v3840_v11 = vand.u32 4294901760, %v2566_v34  ;;  %v3842_v34 = vand.u32 4294901760, %v2594_v60  ;;  %3858 = vst [vmem:[#allocation6_spill] sm:$0xff] %v3004_v59 }
  0x5d   :  { %1962 = vmatprep.subr.mxu0 %v3838_v9  ;;  %1989 = vmatprep.subr.mxu1 %v2283_v15  ;;  %v77_v15 = vld [vmem:[%s3631_s1 + $0x1f0] sm:$0xff] }
  0x5e   :  { %1963 = vmatpush3.msra.mxu0 %v3839_v8  ;;  %1990 = vmatpush3.msra.mxu1 %v2285_v16  ;;  %v2912_v16 = vand.u32 4294901760, %v61_v10  ;;  %v2923_v28 = vand.u32 4294901760, %v77_v15  ;;  %v3863_v9 = vld [vmem:[#allocation12_spill] sm:$0xff] }
  0x5f   :  { %1964 = vmatprep.subr.mxu0 %v3840_v11  ;;  %1991 = vmatprep.subr.mxu1 %v2287_v17  ;;  %v76_v17 = vld [vmem:[%s3631_s1 + $0x1e8] sm:$0xff]  ;;  %v3864_v11 = vld [vmem:[#allocation24_spill] sm:$0xff] }
  0x60   :  { %1965 = vmatpush3.msra.mxu0 %v3841_v21  ;;  %1992 = vmatpush3.msra.mxu1 %v2309_v22  ;;  %v59_v22 = vld [vmem:[%s3631_s1 + $0x160] sm:$0xff]  ;;  %v2936_v60 = vand.u32 4294901760, %v76_v17  ;;  %v2945_v62 = vsub.f32 %v61_v10, %v2912_v16 }
  0x61   :  { %1966 = vmatprep.subr.mxu0 %v3842_v34  ;;  %1993 = vmatprep.subr.mxu1 %v2315_v24  ;;  %v2934_v24 = vsub.f32 %v62_v5, %v2901_v55  ;;  %v2953_v51 = vand.u32 4294901760, %v59_v22  ;;  %v3861_v5 = vld [vmem:[#allocation23_spill] sm:$0xff]  ;;  %v71_v34 = vld [vmem:[%s3631_s1 + $0x1c0] sm:$0xff] }
  0x62   :  { %1967 = vmatpush3.msra.mxu0 %v3843_v6  ;;  %1994 = vmatpush3.msra.mxu1 %v3805_v20  ;;  %3846 = vst [vmem:[#allocation2_spill] sm:$0xff] %v2936_v60  ;;  %v75_v20 = vld [vmem:[%s3631_s1 + $0x1e0] sm:$0xff]  ;;  %v2979_v25 = vsub.f32 %v76_v17, %v2936_v60  ;;  %v3706_v63 = vand.u32 4294901760, %v2945_v62  ;;  %v3046_v17 = vand.u32 4294901760, %v56_v13 }
  0x63   :  { %1968 = vmatprep.subr.mxu0 %v3845_v30  ;;  %1995 = vmatprep.subr.mxu1 %v3807_v7  ;;  %3849 = vst [vmem:[#allocation20_spill] sm:$0xff] %v2953_v51  ;;  %v3850_v7 = vand.u32 4294901760, %v2676_v36  ;;  %v3709_v36 = vand.u32 4294901760, %v2939_v19  ;;  %v2984_v57 = vand.u32 4294901760, %v75_v20  ;;  %v2994_v43 = vsub.f32 %v59_v22, %v2953_v51  ;;  %v55_v6 = vld [vmem:[%s3631_s1 + $0x140] sm:$0xff] }
  0x64   :  { %1969 = vmatpush3.msra.mxu0 %v3847_v54  ;;  %1996 = vmatpush3.msra.mxu1 %v3808_v49  ;;  %v58_v49 = vld [vmem:[%s3631_s1 + $0x158] sm:$0xff]  ;;  %v3705_v41 = vand.u32 4294901760, %v2979_v25  ;;  %v3035_v10 = vsub.f32 %v2945_v62, %v3706_v63  ;;  %3867 = vst [vmem:[#allocation8_spill] sm:$0xff] %v3046_v17  ;;  %v3056_v30 = vsub.f32 %v74_v53, %v2996_v32 }
  0x65   :  { %1970 = vmatprep.subr.mxu0 %v3848_v33  ;;  %1997 = vmatprep.subr.mxu1 %v3809_v50  ;;  %v2968_v50 = vsub.f32 %v77_v15, %v2923_v28  ;;  %3853 = vst [vmem:[#allocation3_spill] sm:$0xff] %v2984_v57  ;;  %v2998_v40 = vand.u32 4294901760, %v58_v49  ;;  %v3038_v8 = vsub.f32 %v75_v20, %v2984_v57  ;;  %v3865_v15 = vand.u32 4294901760, %v3864_v11  ;;  %v3868_v54 = vld [vmem:[#allocation25_spill] sm:$0xff] }
  0x66   :  { %1971 = vmatpush3.msra.mxu0 %v3850_v7  ;;  %1998 = vmatpush3.msra.mxu1 %v3810_v37  ;;  %v3708_v37 = vand.u32 4294901760, %v2934_v24  ;;  %v3704_v22 = vand.u32 4294901760, %v2994_v43  ;;  %v3869_v33 = vand.u32 4294901760, %v3868_v54  ;;  %v3870_v20 = vld [vmem:[#allocation21_spill] sm:$0xff] }
  0x67   :  { %1972 = vmatprep.subr.mxu0 %v3851_v18  ;;  %1999 = vmatprep.subr.mxu1 %v3811_v2  ;;  %v73_v2 = vld [vmem:[%s3631_s1 + $0x1d0] sm:$0xff]  ;;  %3856 = vst [vmem:[#allocation5_spill] sm:$0xff] %v2998_v40  ;;  %v3707_v45 = vand.u32 4294901760, %v2968_v50  ;;  %v3044_v21 = vsub.f32 %v58_v49, %v2998_v40  ;;  %v3067_v49 = vsub.f32 %v57_v23, %v3004_v59  ;;  %v3069_v18 = vand.u32 4294901760, %v72_v4 }
  0x68   :  { %1973 = vmatpush3.msra.mxu0 %v3852_v31  ;;  %2000 = vmatpush3.msra.mxu1 %v3812_v56  ;;  %v3857_v56 = vand.u32 4294901760, %v2721_v61  ;;  %v3016_v61 = vsub.f32 %v2939_v19, %v3709_v36  ;;  %v3023_v3 = vand.u32 4294901760, %v73_v2  ;;  %v3872_v31 = vld [vmem:[#allocation14_spill] sm:$0xff]  ;;  %v3083_v23 = vsub.f32 %v2979_v25, %v3705_v41  ;;  %v52_v36 = vld [vmem:[%s3631_s1 + $0x128] sm:$0xff] }
  0x69   :  { %1974 = vmatprep.subr.mxu0 %v3854_v35  ;;  %2001 = vmatprep.subr.mxu1 %v3813_v27  ;;  %v3703_v27 = vand.u32 4294901760, %v2959_v1  ;;  %v3064_v7 = vsub.f32 %v2968_v50, %v3707_v45  ;;  %3871 = vst [vmem:[#allocation9_spill] sm:$0xff] %v3069_v18  ;;  %v3873_v35 = vld [vmem:[#allocation22_spill] sm:$0xff]  ;;  %v3710_v11 = vand.u32 4294901760, %v3038_v8  ;;  %v3110_v54 = vsub.f32 %v2994_v43, %v3704_v22  ;;  %v3124_v22 = vld [vmem:[%s3631_s1 + $0x1b0] sm:$0xff] }
  0x6a   :  { %1975 = vmatpush3.msra.mxu0 %v3857_v56  ;;  %2002 = vmatpush3.msra.mxu1 %v3814_v47  ;;  %v3021_v47 = vsub.f32 %v2934_v24, %v3708_v37  ;;  %3860 = vst [vmem:[#allocation7_spill] sm:$0xff] %v3023_v3  ;;  %v3713_v41 = vand.u32 4294901760, %v3067_v49  ;;  %v3128_v63 = vsub.f32 %v72_v4, %v3069_v18 }
  0x6b   :  { %1976 = vmatprep.subr.mxu0 %v3859_v0  ;;  %2003 = vmatprep.subr.mxu1 %v3815_v44  ;;  %v3862_v44 = vand.u32 4294901760, %v3861_v5  ;;  %v3074_v53 = vsub.f32 %v2959_v1, %v3703_v27  ;;  %v3086_v5 = vsub.f32 %v73_v2, %v3023_v3  ;;  %v54_v2 = vld [vmem:[%s3631_s1 + $0x138] sm:$0xff]  ;;  %v53_v27 = vld [vmem:[%s3631_s1 + $0x130] sm:$0xff] }
  0x6c   :  { %2004 = vmatpush3.msra.mxu1 %v3863_v9  ;;  %830 = vmatprep.mubr.f32.mxu0 %v3870_v20  ;;  %v3091_v9 = vand.u32 4294901760, %v71_v34 }
  0x6d   :  { %1977 = vmatpush3.msra.mxu0 %v3862_v44  ;;  %2005 = vmatprep.subr.mxu1 %v3866_v48  ;;  %v70_v48 = vld [vmem:[%s3631_s1 + $0x1b8] sm:$0xff]  ;;  %v3716_v37 = vand.u32 4294901760, %v3086_v5  ;;  %v51_v44 = vld [vmem:[%s3631_s1 + $0x120] sm:$0xff] }
  0x6e   :  { %1978 = vmatprep.subr.mxu0 %v3865_v15  ;;  %2006 = vmatpush3.msra.mxu1 %v3872_v31  ;;  %3874 = vst [vmem:[#allocation10_spill] sm:$0xff] %v3091_v9  ;;  %v3094_v15 = vand.u32 4294901760, %v55_v6  ;;  %v3712_v31 = vand.u32 4294901760, %v3044_v21  ;;  %v3133_v45 = vand.u32 4294901760, %v70_v48 }
  0x6f   :  { %1979 = vmatpush3.msra.mxu0 %v3869_v33  ;;  %2007 = vmatprep.subr.mxu1 %v2555_v39  ;;  %v3105_v39 = vsub.f32 %v56_v13, %v3046_v17  ;;  %v3711_v33 = vand.u32 4294901760, %v3056_v30  ;;  %v3151_v13 = vand.u32 4294901760, %v53_v27  ;;  %v3200_v56 = vsub.f32 %v3086_v5, %v3716_v37 }
  0x70   :  { %832 = vmatmul.mubr.f32.vlgmr.msra.gmra.mxu0 %v3873_v35  ;;  %2018 = vmatprep.subr.mxu0 %v2899_v42  ;;  %3875 = vst [vmem:[#allocation11_spill] sm:$0xff] %v3094_v15  ;;  %3877 = vst [vmem:[#allocation16_spill] sm:$0xff] %v3133_v45  ;;  %v3149_v4 = vsub.f32 %v55_v6, %v3094_v15  ;;  %v3205_v0 = vsub.f32 %v70_v48, %v3133_v45  ;;  %v3886_v37 = vand.u32 4294901760, %v3016_v61 }
  0x71   :  { %2008 = vmatpush3.msra.mxu1 %v3819_v26  ;;  %2019 = vmatpush3.msra.mxu0 %v2901_v55  ;;  %3876 = vst [vmem:[#allocation15_spill] sm:$0xff] %v3105_v39  ;;  %v1177_v26 = vand.u32 4294901760, %v3064_v7  ;;  %v3135_v7 = vand.u32 4294901760, %v54_v2  ;;  %3880 = vst [vmem:[#allocation23_spill] sm:$0xff] %v3151_v13  ;;  %v3165_v6 = vsub.f32 %v3056_v30, %v3711_v33  ;;  %v68_v33 = vld [vmem:[%s3631_s1 + $0x1a8] sm:$0xff] }
  0x72   :  { %2009 = vmatprep.subr.mxu1 %v3821_v12  ;;  %2020 = vmatprep.subr.mxu0 %v2923_v28  ;;  %3879 = vst [vmem:[#allocation19_spill] sm:$0xff] %v3149_v4  ;;  %v3154_v12 = vsub.f32 %v71_v34, %v3091_v9  ;;  %v3170_v34 = vsub.f32 %v3044_v21, %v3712_v31  ;;  %v3186_v31 = vand.u32 4294901760, %v52_v36 }
  0x73   :  { %2010 = vmatpush3.msra.mxu1 %v3823_v29  ;;  %2021 = vmatpush3.msra.mxu0 %v2912_v16  ;;  %3878 = vst [vmem:[#allocation17_spill] sm:$0xff] %v3135_v7  ;;  %v3146_v29 = vsub.f32 %v3038_v8, %v3710_v11  ;;  %v3173_v11 = vand.u32 4294901760, %v3124_v22  ;;  %v1198_v48 = vand.u32 4294901760, %v3165_v6  ;;  %v3889_v6 = vand.u32 4294901760, %v3128_v63 }
  0x74   :  { %2011 = vmatprep.subr.mxu1 %v3825_v14  ;;  %2022 = vmatprep.subr.mxu0 %v2936_v60  ;;  %3881 = vst [vmem:[#allocation12_spill] sm:$0xff] %v3154_v12  ;;  %3883 = vst [vmem:[#allocation13_spill] sm:$0xff] %v3186_v31  ;;  %v3202_v14 = vand.u32 4294901760, %v51_v44 }
  0x75   :  { %2012 = vmatpush3.msra.mxu1 %v2633_v38  ;;  %2023 = vmatpush3.msra.mxu0 %v2925_v46  ;;  %3882 = vst [vmem:[#allocation24_spill] sm:$0xff] %v3173_v11  ;;  %v3180_v38 = vsub.f32 %v3067_v49, %v3713_v41  ;;  %v3195_v41 = vsub.f32 %v54_v2, %v3135_v7  ;;  %v3220_v46 = vand.u32 4294901760, %v68_v33  ;;  %v3890_v2 = vand.u32 4294901760, %v3105_v39 }
  0x76   :  { %2013 = vmatprep.subr.mxu1 %v2650_v52  ;;  %2024 = vmatprep.subr.mxu0 %v2984_v57  ;;  %v67_v52 = vld [vmem:[%s3631_s1 + $0x1a0] sm:$0xff]  ;;  %3884 = vst [vmem:[#allocation25_spill] sm:$0xff] %v3202_v14  ;;  %v3240_v57 = vsub.f32 %v52_v36, %v3186_v31  ;;  %v3256_v36 = vsub.f32 %v51_v44, %v3202_v14 }
  0x77   :  { %2014 = vmatpush3.msra.mxu1 %v2672_v58  ;;  %934 = vmatprep.mubr.f32.mxu1 %v3870_v20  ;;  %v1191_v58 = vand.u32 4294901760, %v3146_v29  ;;  %v3211_v20 = vsub.f32 %v53_v27, %v3151_v13  ;;  %3887 = vst [vmem:[#allocation14_spill] sm:$0xff] %v3220_v46  ;;  %v50_v27 = vld [vmem:[%s3631_s1 + $0x118] sm:$0xff] }
  0x78   :  { %2025 = vmatpush3.msra.mxu0 %v2953_v51  ;;  %936 = vmatmul.mubr.f32.vlgmr.msra.gmra.mxu1 %v3873_v35  ;;  %v1086_v51 = vand.u32 4294901760, %v3170_v34  ;;  %v3222_v35 = vand.u32 4294901760, %v67_v52  ;;  %v14_v29 = vld [vmem:[%s3632_s0 + $0x18] sm:$0xff]  ;;  %v3237_v34 = vsub.f32 %v3128_v63, %v3889_v6  ;;  %v1205_v6 = vand.u32 4294901760, %v3200_v56  ;;  %3891 = vst [vmem:[#allocation22_spill] sm:$0xff] %v3256_v36 }
  0x79   :  { %3885 = vst [vmem:[#allocation21_spill] sm:$0xff] %v3211_v20  ;;  %2026 = vmatprep.subr.mxu0 %v2996_v32  ;;  %2053 = vmatprep.subr.mxu1 %v3886_v37  ;;  %v3888_v37 = vand.u32 4294901760, %v3021_v47  ;;  %v3245_v32 = vsub.f32 %v3105_v39, %v3890_v2  ;;  %v49_v47 = vld [vmem:[%s3631_s1 + $0x110] sm:$0xff]  ;;  %v66_v2 = vld [vmem:[%s3631_s1 + $0x198] sm:$0xff]  ;;  %v3893_v56 = vand.u32 4294901760, %v3154_v12  ;;  %v3279_v61 = vand.u32 4294901760, %v50_v27 }
  0x7a   :  { %2027 = vmatpush3.msra.mxu0 %v2998_v40  ;;  %v3264_v40 = vsub.f32 %v3124_v22, %v3173_v11  ;;  %v65_v22 = vld [vmem:[%s3631_s1 + $0x190] sm:$0xff]  ;;  %v1212_v60 = vand.u32 4294901760, %v3237_v34 }
  0x7b   :  { %2054 = vmatpush3.msra.mxu1 %v3888_v37  ;;  %v13_v37 = vld [vmem:[%s3632_s0 + $0x10] sm:$0xff]  ;;  %2028 = vmatprep.subr.mxu0 %v3023_v3  ;;  %v3892_v3 = vand.u32 4294901760, %v3035_v10  ;;  %v3272_v44 = vsub.f32 %v3154_v12, %v3893_v56  ;;  %v3290_v56 = vand.u32 4294901760, %v49_v47  ;;  %v3898_v12 = vand.u32 4294901760, %v3074_v53  ;;  %v48_v53 = vld [vmem:[%s3631_s1 + $0x108] sm:$0xff] }
  0x7c   :  { %2055 = vmatprep.subr.mxu1 %v1177_v26  ;;  %2029 = vmatpush3.msra.mxu0 %v3004_v59  ;;  %v3894_v26 = vand.u32 4294901760, %v3149_v4  ;;  %v3284_v59 = vand.u32 4294901760, %v14_v29 }
  0x7d   :  { %2056 = vmatpush3.msra.mxu1 %v3892_v3  ;;  %2030 = vmatprep.subr.mxu0 %v3069_v18  ;;  %v3896_v3 = vand.u32 4294901760, %v3083_v23  ;;  %v1100_v18 = vand.u32 4294901760, %v3245_v32  ;;  %v3302_v23 = vand.u32 4294901760, %v66_v2  ;;  %v64_v32 = vld [vmem:[%s3631_s1 + $0x188] sm:$0xff]  ;;  %v1219_v34 = vand.u32 4294901760, %v3272_v44 }
  0x7e   :  { %v3277_v39 = vsub.f32 %v3149_v4, %v3894_v26  ;;  %3895 = vst [vmem:[#allocation26_spill] sm:$0xff] %v3284_v59  ;;  %v3293_v26 = vsub.f32 %v68_v33, %v3220_v46  ;;  %v3295_v4 = vand.u32 4294901760, %v13_v37  ;;  %2031 = vmatpush3.msra.mxu0 %v3046_v17  ;;  %v3899_v33 = vand.u32 4294901760, %v3205_v0  ;;  %1278 = vmatprep.mubr.f32.mxu1 %v3284_v59 }
  0x7f   :  { %2057 = vmatprep.subr.mxu1 %v3896_v3  ;;  %2032 = vmatprep.subr.mxu0 %v3091_v9  ;;  %v3311_v17 = vand.u32 4294901760, %v65_v22  ;;  %v3326_v3 = vsub.f32 %v50_v27, %v3279_v61  ;;  %v3332_v9 = vsub.f32 %v14_v29, %v3284_v59  ;;  %v3339_v44 = vsub.f32 %v49_v47, %v3290_v56  ;;  %v63_v27 = vld [vmem:[%s3631_s1 + $0x180] sm:$0xff]  ;;  %v3938_v59 = vld [vmem:[#allocation23_spill] sm:$0xff] }
  0x80   :  { %3897 = vst [vmem:[#allocation27_spill] sm:$0xff] %v3295_v4  ;;  %2058 = vmatpush3.msra.mxu1 %v3898_v12  ;;  %v3309_v10 = vsub.f32 %v3205_v0, %v3899_v33  ;;  %v3318_v12 = vsub.f32 %v67_v52, %v3222_v35  ;;  %2033 = vmatpush3.msra.mxu0 %v3094_v15  ;;  %v1107_v33 = vand.u32 4294901760, %v3277_v39  ;;  %v47_v29 = vld [vmem:[%s3631_s1 + $0x100] sm:$0xff]  ;;  %v3904_v15 = vand.u32 4294901760, %v3264_v40 }
  0x81   :  { %2059 = vmatprep.subr.mxu1 %v1191_v58  ;;  %3900 = vst [vmem:[#allocation28_spill] sm:$0xff] %v3311_v17  ;;  %v3901_v58 = vand.u32 4294901760, %v3110_v54  ;;  %2034 = vmatprep.subr.mxu0 %v3133_v45  ;;  %v3902_v54 = vand.u32 4294901760, %v3195_v41  ;;  %v3359_v45 = vsub.f32 %v66_v2, %v3302_v23  ;;  %v3905_v39 = vand.u32 4294901760, %v3180_v38 }
  0x82   :  { %2035 = vmatpush3.msra.mxu0 %v3135_v7  ;;  %v3366_v7 = vand.u32 4294901760, %v48_v53  ;;  %v3372_v2 = vand.u32 4294901760, %v63_v27  ;;  %v3757_v38 = vand.u32 4294901760, %v3256_v36 }
  0x83   :  { %2060 = vmatpush3.msra.mxu1 %v3901_v58  ;;  %v1113_v52 = vsub.f32 %v3195_v41, %v3902_v54  ;;  %v3349_v58 = vsub.f32 %v13_v37, %v3295_v4  ;;  %v3355_v54 = vand.u32 4294901760, %v64_v32  ;;  %2036 = vmatprep.subr.mxu0 %v3173_v11  ;;  %v1226_v37 = vand.u32 4294901760, %v3309_v10 }
  0x84   :  { %2061 = vmatprep.subr.mxu1 %v1198_v48  ;;  %v3903_v48 = vand.u32 4294901760, %v3211_v20  ;;  %2037 = vmatpush3.msra.mxu0 %v3151_v13  ;;  %v3378_v10 = vsub.f32 %v65_v22, %v3311_v17 }
  0x85   :  { %2062 = vmatpush3.msra.mxu1 %v1086_v51  ;;  %v1232_v51 = vsub.f32 %v3264_v40, %v3904_v15  ;;  %2038 = vmatprep.subr.mxu0 %v3220_v46  ;;  %v1114_v15 = vand.u32 4294901760, %v1113_v52 }
  0x86   :  { %v1120_v47 = vsub.f32 %v3211_v20, %v3903_v48  ;;  %2063 = vmatprep.subr.mxu1 %v1205_v6  ;;  %v3374_v20 = vand.u32 4294901760, %v47_v29  ;;  %v3906_v48 = vand.u32 4294901760, %v3293_v26  ;;  %2039 = vmatpush3.msra.mxu0 %v3186_v31  ;;  %v3907_v6 = vand.u32 4294901760, %v3240_v57 }
  0x87   :  { %2064 = vmatpush3.msra.mxu1 %v3905_v39  ;;  %2040 = vmatprep.subr.mxu0 %v3222_v35  ;;  %v1233_v52 = vand.u32 4294901760, %v1232_v51  ;;  %v3908_v39 = vand.u32 4294901760, %v3318_v12 }
  0x88   :  { %2065 = vmatprep.subr.mxu1 %v1212_v60  ;;  %v1239_v13 = vsub.f32 %v3293_v26, %v3906_v48  ;;  %v1121_v11 = vand.u32 4294901760, %v1120_v47  ;;  %v1127_v22 = vsub.f32 %v3240_v57, %v3907_v6  ;;  %v3392_v60 = vsub.f32 %v64_v32, %v3355_v54  ;;  %2041 = vmatpush3.msra.mxu0 %v3202_v14 }
  0x89   :  { %2066 = vmatpush3.msra.mxu1 %v1100_v18  ;;  %v3396_v48 = vsub.f32 %v48_v53, %v3366_v7  ;;  %v1246_v18 = vsub.f32 %v3318_v12, %v3908_v39  ;;  %v3404_v6 = vsub.f32 %v47_v29, %v3374_v20  ;;  %v3910_v32 = vand.u32 4294901760, %v3332_v9  ;;  %2042 = vmatprep.subr.mxu0 %v3302_v23 }
  0x8a   :  { %2067 = vmatprep.subr.mxu1 %v1219_v34  ;;  %v3411_v53 = vsub.f32 %v63_v27, %v3372_v2  ;;  %v1240_v39 = vand.u32 4294901760, %v1239_v13  ;;  %v3912_v29 = vand.u32 4294901760, %v3349_v58  ;;  %2043 = vmatpush3.msra.mxu0 %v3279_v61  ;;  %v3913_v27 = vand.u32 4294901760, %v3359_v45 }
  0x8b   :  { %2068 = vmatpush3.msra.mxu1 %v1107_v33  ;;  %3909 = vst [vmem:[#allocation29_spill] sm:$0xff] %v3404_v6  ;;  %v1040_v34 = vsub.f32 %v3332_v9, %v3910_v32  ;;  %v1134_v33 = vsub.f32 %v3256_v36, %v3757_v38  ;;  %v1128_v32 = vand.u32 4294901760, %v1127_v22  ;;  %2044 = vmatprep.subr.mxu0 %v3311_v17  ;;  %v3914_v38 = vand.u32 4294901760, %v3326_v3 }
  0x8c   :  { %3911 = vst [vmem:[#allocation30_spill] sm:$0xff] %v3411_v53  ;;  %2069 = vmatprep.subr.mxu1 %v1226_v37  ;;  %v1046_v47 = vsub.f32 %v3349_v58, %v3912_v29  ;;  %v1253_v51 = vsub.f32 %v3359_v45, %v3913_v27  ;;  %v1247_v37 = vand.u32 4294901760, %v1246_v18  ;;  %2045 = vmatpush3.msra.mxu0 %v3290_v56  ;;  %v3915_v22 = vand.u32 4294901760, %v3378_v10 }
  0x8d   :  { %2070 = vmatpush3.msra.mxu1 %v1114_v15  ;;  %v1141_v29 = vsub.f32 %v3326_v3, %v3914_v38  ;;  %v1041_v15 = vand.u32 4294901760, %v1040_v34  ;;  %v3761_v13 = vand.u32 4294901760, %v3411_v53  ;;  %2046 = vmatprep.subr.mxu0 %v3355_v54  ;;  %v3916_v17 = vand.u32 4294901760, %v3339_v44 }
  0x8e   :  { %2071 = vmatprep.subr.mxu1 %v1233_v52  ;;  %v1260_v27 = vsub.f32 %v3378_v10, %v3915_v22  ;;  %v1135_v52 = vand.u32 4294901760, %v1134_v33  ;;  %v1047_v18 = vand.u32 4294901760, %v1046_v47  ;;  %v3760_v46 = vand.u32 4294901760, %v3404_v6  ;;  %2047 = vmatpush3.msra.mxu0 %v3366_v7 }
  0x8f   :  { %2072 = vmatpush3.msra.mxu1 %v1121_v11  ;;  %v1148_v38 = vsub.f32 %v3339_v44, %v3916_v17  ;;  %v1254_v11 = vand.u32 4294901760, %v1253_v51  ;;  %v3917_v34 = vand.u32 4294901760, %v3392_v60  ;;  %2048 = vmatprep.subr.mxu0 %v3372_v2  ;;  %v3918_v47 = vand.u32 4294901760, %v3396_v48 }
  0x90   :  { %2073 = vmatprep.subr.mxu1 %v1240_v39  ;;  %v1142_v39 = vand.u32 4294901760, %v1141_v29  ;;  %2049 = vmatpush3.msra.mxu0 %v3374_v20  ;;  %v1261_v17 = vand.u32 4294901760, %v1260_v27  ;;  %v1274_v51 = vsub.f32 %v3411_v53, %v3761_v13  ;;  %v3936_v13 = vld [vmem:[#allocation17_spill] sm:$0xff] }
  0x91   :  { %2074 = vmatpush3.msra.mxu1 %v1128_v32  ;;  %v1267_v22 = vsub.f32 %v3392_v60, %v3917_v34  ;;  %v1155_v33 = vsub.f32 %v3396_v48, %v3918_v47  ;;  %1042 = vmatprep.mubr.f32.mxu0 %v1041_v15  ;;  %v1149_v32 = vand.u32 4294901760, %v1148_v38  ;;  %v3920_v38 = vld [vmem:[#allocation15_spill] sm:$0xff]  ;;  %v3922_v34 = vld [vmem:[#allocation12_spill] sm:$0xff] }
  0x92   :  { %2075 = vmatprep.subr.mxu1 %v1247_v37  ;;  %1048 = vmatmul.mubr.f32.vlgmr.msra.gmra.mxu0 %v1047_v18  ;;  %v1162_v37 = vsub.f32 %v3404_v6, %v3760_v46  ;;  %v1275_v27 = vand.u32 4294901760, %v1274_v51  ;;  %v3919_v18 = vld [vmem:[#allocation2_spill] sm:$0xff]  ;;  %v3925_v47 = vld [vmem:[#allocation20_spill] sm:$0xff]  ;;  %v3928_v51 = vld [vmem:[#allocation7_spill] sm:$0xff] }
  0x93   :  { %2076 = vmatpush3.msra.mxu1 %v1135_v52  ;;  %2088 = vmatprep.subr.mxu0 %v2939_v19  ;;  %v1268_v29 = vand.u32 4294901760, %v1267_v22  ;;  %v1156_v15 = vand.u32 4294901760, %v1155_v33  ;;  %v3923_v22 = vld [vmem:[#allocation3_spill] sm:$0xff]  ;;  %v3926_v33 = vld [vmem:[#allocation4_spill] sm:$0xff] }
  0x94   :  { %2077 = vmatprep.subr.mxu1 %v1254_v11  ;;  %2089 = vmatpush3.msra.mxu0 %v2934_v24  ;;  %v1163_v52 = vand.u32 4294901760, %v1162_v37  ;;  %v3921_v11 = vld [vmem:[#allocation18_spill] sm:$0xff]  ;;  %v3935_v46 = vld [vmem:[#allocation16_spill] sm:$0xff] }
  0x95   :  { %2078 = vmatpush3.msra.mxu1 %v1142_v39  ;;  %2090 = vmatprep.subr.mxu0 %v2968_v50  ;;  %v3924_v39 = vld [vmem:[#allocation19_spill] sm:$0xff]  ;;  %v3930_v37 = vld [vmem:[#allocation6_spill] sm:$0xff] }
  0x96   :  { %2079 = vmatprep.subr.mxu1 %v1261_v17  ;;  %2091 = vmatpush3.msra.mxu0 %v2945_v62  ;;  %v3927_v17 = vld [vmem:[#allocation5_spill] sm:$0xff] }
  0x97   :  { %2080 = vmatpush3.msra.mxu1 %v1149_v32  ;;  %2092 = vmatprep.subr.mxu0 %v2979_v25  ;;  %v3929_v32 = vld [vmem:[#allocation21_spill] sm:$0xff] }
  0x98   :  { %2081 = vmatprep.subr.mxu1 %v1268_v29  ;;  %2093 = vmatpush3.msra.mxu0 %v2959_v1  ;;  %v3931_v29 = vld [vmem:[#allocation9_spill] sm:$0xff] }
  0x99   :  { %2082 = vmatpush3.msra.mxu1 %v1156_v15  ;;  %2094 = vmatprep.subr.mxu0 %v3038_v8  ;;  %v3932_v15 = vld [vmem:[#allocation8_spill] sm:$0xff] }
  0x9a   :  { %2083 = vmatprep.subr.mxu1 %v1275_v27  ;;  %2095 = vmatpush3.msra.mxu0 %v2994_v43  ;;  %v3933_v27 = vld [vmem:[#allocation10_spill] sm:$0xff] }
  0x9b   :  { %2084 = vmatpush3.msra.mxu1 %v1163_v52  ;;  %2096 = vmatprep.subr.mxu0 %v3056_v30  ;;  %v3934_v52 = vld [vmem:[#allocation11_spill] sm:$0xff] }
  0x9c   :  { %1280 = vmatmul.mubr.f32.vlgmr.msra.gmra.mxu1 %v3295_v4  ;;  %2123 = vmatprep.subr.mxu1 %v2899_v42  ;;  %v3937_v4 = vld [vmem:[#allocation24_spill] sm:$0xff] }
  0x9d   :  { %2097 = vmatpush3.msra.mxu0 %v3044_v21  ;;  %2124 = vmatpush3.msra.mxu1 %v2901_v55 }
  0x9e   :  { %2098 = vmatprep.subr.mxu0 %v3086_v5  ;;  %2125 = vmatprep.subr.mxu1 %v2923_v28 }
  0x9f   :  { %2099 = vmatpush3.msra.mxu0 %v3067_v49  ;;  %2126 = vmatpush3.msra.mxu1 %v2912_v16 }
  0xa0   :  { %2100 = vmatprep.subr.mxu0 %v3128_v63  ;;  %2127 = vmatprep.subr.mxu1 %v3919_v18 }
  0xa1   :  { %2101 = vmatpush3.msra.mxu0 %v3920_v38  ;;  %2128 = vmatpush3.msra.mxu1 %v3921_v11 }
  0xa2   :  { %2102 = vmatprep.subr.mxu0 %v3922_v34  ;;  %2129 = vmatprep.subr.mxu1 %v3923_v22 }
  0xa3   :  { %2103 = vmatpush3.msra.mxu0 %v3924_v39  ;;  %2130 = vmatpush3.msra.mxu1 %v3925_v47 }
  0xa4   :  { %2104 = vmatprep.subr.mxu0 %v3205_v0  ;;  %2131 = vmatprep.subr.mxu1 %v3926_v33 }
  0xa5   :  { %2105 = vmatpush3.msra.mxu0 %v3195_v41  ;;  %2132 = vmatpush3.msra.mxu1 %v3927_v17 }
  0xa6   :  { %2106 = vmatprep.subr.mxu0 %v3264_v40  ;;  %2133 = vmatprep.subr.mxu1 %v3928_v51 }
  0xa7   :  { %2107 = vmatpush3.msra.mxu0 %v3929_v32  ;;  %2134 = vmatpush3.msra.mxu1 %v3930_v37 }
  0xa8   :  { %2108 = vmatprep.subr.mxu0 %v3293_v26  ;;  %2135 = vmatprep.subr.mxu1 %v3931_v29 }
  0xa9   :  { %2109 = vmatpush3.msra.mxu0 %v3240_v57  ;;  %2136 = vmatpush3.msra.mxu1 %v3932_v15 }
  0xaa   :  { %2110 = vmatprep.subr.mxu0 %v3318_v12  ;;  %2137 = vmatprep.subr.mxu1 %v3933_v27 }
  0xab   :  { %2111 = vmatpush3.msra.mxu0 %v3256_v36  ;;  %2138 = vmatpush3.msra.mxu1 %v3934_v52  ;;  %v3939_v36 = vld [vmem:[#allocation14_spill] sm:$0xff] }
  0xac   :  { %2112 = vmatprep.subr.mxu0 %v3359_v45  ;;  %2139 = vmatprep.subr.mxu1 %v3935_v46 }
  0xad   :  { %2113 = vmatpush3.msra.mxu0 %v3326_v3  ;;  %2140 = vmatpush3.msra.mxu1 %v3936_v13 }
  0xae   :  { %2114 = vmatprep.subr.mxu0 %v3378_v10  ;;  %2141 = vmatprep.subr.mxu1 %v3937_v4 }
  0xaf   :  { %2115 = vmatpush3.msra.mxu0 %v3339_v44  ;;  %2142 = vmatpush3.msra.mxu1 %v3938_v59 }
  0xb0   :  { %2116 = vmatprep.subr.mxu0 %v3392_v60  ;;  %2143 = vmatprep.subr.mxu1 %v3939_v36  ;;  %v3940_v36 = vand.u32 4294901760, %v2939_v19  ;;  %v3945_v19 = vand.u32 4294901760, %v2979_v25  ;;  %v3950_v25 = vand.u32 4294901760, %v3349_v58 }
  0xb1   :  { %2117 = vmatpush3.msra.mxu0 %v3396_v48  ;;  %2144 = vmatpush3.msra.mxu1 %v3186_v31  ;;  %v3941_v31 = vand.u32 4294901760, %v2934_v24  ;;  %v3946_v24 = vand.u32 4294901760, %v2959_v1  ;;  %v3952_v1 = vand.u32 4294901760, %v3044_v21  ;;  %v3961_v21 = vand.u32 4294901760, %v3264_v40 }
  0xb2   :  { %2118 = vmatprep.subr.mxu0 %v3411_v53  ;;  %2145 = vmatprep.subr.mxu1 %v3222_v35  ;;  %v3942_v53 = vld [vmem:[#allocation28_spill] sm:$0xff]  ;;  %v3965_v40 = vand.u32 4294901760, %v3318_v12  ;;  %v3971_v12 = vand.u32 4294901760, %v3339_v44 }
  0xb3   :  { %2119 = vmatpush3.msra.mxu0 %v3404_v6  ;;  %1415 = vmatprep.mubr.f32.mxu0 %v3332_v9  ;;  %v3943_v6 = vand.u32 4294901760, %v2968_v50  ;;  %v3947_v50 = vand.u32 4294901760, %v3038_v8  ;;  %v3953_v8 = vand.u32 4294901760, %v3086_v5  ;;  %v3966_v5 = vld [vmem:[#allocation22_spill] sm:$0xff] }
  0xb4   :  { %2146 = vmatpush3.msra.mxu1 %v3202_v14  ;;  %1418 = vmatmul.mubr.f32.vlgmr.msra.gmra.mxu0 %v3349_v58  ;;  %v3944_v14 = vand.u32 4294901760, %v2945_v62  ;;  %v3948_v62 = vand.u32 4294901760, %v3332_v9  ;;  %v3967_v9 = vand.u32 4294901760, %v3966_v5  ;;  %v3973_v58 = vld [vmem:[#allocation14_spill] sm:$0xff] }
  0xb5   :  { %2147 = vmatprep.subr.mxu1 %v3302_v23  ;;  %2158 = vmatprep.subr.mxu0 %v3940_v36  ;;  %v3968_v36 = vand.u32 4294901760, %v3359_v45  ;;  %v3972_v45 = vand.u32 4294901760, %v3392_v60  ;;  %v3982_v60 = vld [vmem:[#allocation27_spill] sm:$0xff] }
  0xb6   :  { %2148 = vmatpush3.msra.mxu1 %v3279_v61  ;;  %2159 = vmatpush3.msra.mxu0 %v3941_v31  ;;  %v3949_v31 = vand.u32 4294901760, %v2994_v43  ;;  %v3954_v43 = vand.u32 4294901760, %v3067_v49  ;;  %v3962_v49 = vand.u32 4294901760, %v3929_v32 }
  0xb7   :  { %2149 = vmatprep.subr.mxu1 %v3942_v53  ;;  %2160 = vmatprep.subr.mxu0 %v3943_v6  ;;  %v3976_v6 = vld [vmem:[#allocation30_spill] sm:$0xff] }
  0xb8   :  { %2150 = vmatpush3.msra.mxu1 %v3290_v56  ;;  %2161 = vmatpush3.msra.mxu0 %v3944_v14  ;;  %v3951_v14 = vand.u32 4294901760, %v3056_v30  ;;  %v3955_v30 = vand.u32 4294901760, %v3128_v63  ;;  %v3960_v63 = vand.u32 4294901760, %v3195_v41  ;;  %v3964_v41 = vand.u32 4294901760, %v3240_v57 }
  0xb9   :  { %2151 = vmatprep.subr.mxu1 %v3355_v54  ;;  %2162 = vmatprep.subr.mxu0 %v3945_v19  ;;  %v3969_v57 = vand.u32 4294901760, %v3326_v3  ;;  %v3975_v3 = vld [vmem:[#allocation13_spill] sm:$0xff] }
  0xba   :  { %2152 = vmatpush3.msra.mxu1 %v3366_v7  ;;  %2163 = vmatpush3.msra.mxu0 %v3946_v24 }
  0xbb   :  { %2153 = vmatprep.subr.mxu1 %v3372_v2  ;;  %2164 = vmatprep.subr.mxu0 %v3947_v50 }
  0xbc   :  { %2154 = vmatpush3.msra.mxu1 %v3374_v20  ;;  %1522 = vmatprep.mubr.f32.mxu1 %v3948_v62 }
  0xbd   :  { %2165 = vmatpush3.msra.mxu0 %v3949_v31  ;;  %1526 = vmatmul.mubr.f32.vlgmr.msra.gmra.mxu1 %v3950_v25 }
  0xbe   :  { %2166 = vmatprep.subr.mxu0 %v3951_v14  ;;  %2193 = vmatprep.subr.mxu1 %v2899_v42  ;;  %v3956_v42 = vand.u32 4294901760, %v3920_v38 }
  0xbf   :  { %2167 = vmatpush3.msra.mxu0 %v3952_v1  ;;  %2194 = vmatpush3.msra.mxu1 %v2901_v55  ;;  %v3957_v55 = vand.u32 4294901760, %v3922_v34 }
  0xc0   :  { %2168 = vmatprep.subr.mxu0 %v3953_v8  ;;  %2195 = vmatprep.subr.mxu1 %v2923_v28  ;;  %v3958_v28 = vand.u32 4294901760, %v3924_v39 }
  0xc1   :  { %2169 = vmatpush3.msra.mxu0 %v3954_v43  ;;  %2196 = vmatpush3.msra.mxu1 %v2912_v16  ;;  %v3959_v16 = vand.u32 4294901760, %v3205_v0  ;;  %v3963_v0 = vand.u32 4294901760, %v3293_v26  ;;  %v3970_v26 = vand.u32 4294901760, %v3378_v10  ;;  %v3977_v10 = vand.u32 4294901760, %v3976_v6 }
  0xc2   :  { %2170 = vmatprep.subr.mxu0 %v3955_v30  ;;  %2197 = vmatprep.subr.mxu1 %v3919_v18 }
  0xc3   :  { %2171 = vmatpush3.msra.mxu0 %v3956_v42  ;;  %2198 = vmatpush3.msra.mxu1 %v3921_v11 }
  0xc4   :  { %2172 = vmatprep.subr.mxu0 %v3957_v55  ;;  %2199 = vmatprep.subr.mxu1 %v3923_v22 }
  0xc5   :  { %2173 = vmatpush3.msra.mxu0 %v3958_v28  ;;  %2200 = vmatpush3.msra.mxu1 %v3925_v47 }
  0xc6   :  { %2174 = vmatprep.subr.mxu0 %v3959_v16  ;;  %2201 = vmatprep.subr.mxu1 %v3926_v33 }
  0xc7   :  { %2175 = vmatpush3.msra.mxu0 %v3960_v63  ;;  %2202 = vmatpush3.msra.mxu1 %v3927_v17 }
  0xc8   :  { %2176 = vmatprep.subr.mxu0 %v3961_v21  ;;  %2203 = vmatprep.subr.mxu1 %v3928_v51 }
  0xc9   :  { %2177 = vmatpush3.msra.mxu0 %v3962_v49  ;;  %2204 = vmatpush3.msra.mxu1 %v3930_v37 }
  0xca   :  { %2178 = vmatprep.subr.mxu0 %v3963_v0  ;;  %2205 = vmatprep.subr.mxu1 %v3931_v29 }
  0xcb   :  { %2179 = vmatpush3.msra.mxu0 %v3964_v41  ;;  %2206 = vmatpush3.msra.mxu1 %v3932_v15 }
  0xcc   :  { %2180 = vmatprep.subr.mxu0 %v3965_v40  ;;  %2207 = vmatprep.subr.mxu1 %v3933_v27 }
  0xcd   :  { %2181 = vmatpush3.msra.mxu0 %v3967_v9  ;;  %2208 = vmatpush3.msra.mxu1 %v3934_v52 }
  0xce   :  { %2182 = vmatprep.subr.mxu0 %v3968_v36  ;;  %2209 = vmatprep.subr.mxu1 %v3935_v46  ;;  %v3974_v46 = vand.u32 4294901760, %v3396_v48 }
  0xcf   :  { %2183 = vmatpush3.msra.mxu0 %v3969_v57  ;;  %2210 = vmatpush3.msra.mxu1 %v3936_v13  ;;  %v3980_v13 = vld [vmem:[#allocation26_spill] sm:$0xff] }
  0xd0   :  { %2184 = vmatprep.subr.mxu0 %v3970_v26  ;;  %2211 = vmatprep.subr.mxu1 %v3937_v4  ;;  %v3978_v4 = vld [vmem:[#allocation29_spill] sm:$0xff] }
  0xd1   :  { %2185 = vmatpush3.msra.mxu0 %v3971_v12  ;;  %2212 = vmatpush3.msra.mxu1 %v3938_v59  ;;  %v3979_v44 = vand.u32 4294901760, %v3978_v4  ;;  %v3981_v59 = vld [vmem:[#allocation25_spill] sm:$0xff] }
  0xd2   :  { %2186 = vmatprep.subr.mxu0 %v3972_v45  ;;  %2213 = vmatprep.subr.mxu1 %v3973_v58 }
  0xd3   :  { %2187 = vmatpush3.msra.mxu0 %v3974_v46  ;;  %2214 = vmatpush3.msra.mxu1 %v3975_v3 }
  0xd4   :  { %2188 = vmatprep.subr.mxu0 %v3977_v10  ;;  %2215 = vmatprep.subr.mxu1 %v3222_v35 }
  0xd5   :  { %2189 = vmatpush3.msra.mxu0 %v3979_v44  ;;  %1692 = vmatprep.mubr.f32.mxu0 %v3980_v13 }
  0xd6   :  { %2216 = vmatpush3.msra.mxu1 %v3981_v59  ;;  %1694 = vmatmul.mubr.f32.vlgmr.msra.gmra.mxu0 %v3982_v60 }
  0xd7   :  { %2217 = vmatprep.subr.mxu1 %v3302_v23  ;;  %1796 = vmatprep.mubr.f32.mxu1 %v3980_v13 }
  0xd8   :  { %2218 = vmatpush3.msra.mxu1 %v3279_v61 }
  0xd9   :  { %2219 = vmatprep.subr.mxu1 %v3942_v53 }
  0xda   :  { %2220 = vmatpush3.msra.mxu1 %v3290_v56 }
  0xdb   :  { %2221 = vmatprep.subr.mxu1 %v3355_v54 }
  0xdc   :  { %2222 = vmatpush3.msra.mxu1 %v3366_v7 }
  0xdd   :  { %2223 = vmatprep.subr.mxu1 %v3372_v2 }
  0xde   :  { %2224 = vmatpush3.msra.mxu1 %v3374_v20 }
  0xdf   :  { %1798 = vmatmul.mubr.f32.vlgmr.msra.gmra.mxu1 %v3982_v60 }
  0xec   :  { %v1840_v35 = vpop.f32.mrf.mxu0 }
  0xee   :  { %v1841_v23 = vpop.f32.mrf.mxu0 }
  0xef   :  { %v1842_v47 = vadd.f32 %v1841_v23, %v1840_v35 }
  0xf5   :  { %v1875_v48 = vpop.f32.mrf.mxu1 }
  0xf7   :  { %v1876_v38 = vpop.f32.mrf.mxu1 }
  0xf8   :  { %v1877_v39 = vadd.f32 %v1876_v38, %v1875_v48 }
  0xfa   :  { %v420_v17 = vadd.f32 %v1877_v39, %v1842_v47 }
 0x10d   :  { %v1910_v18 = vpop.f32.mrf.mxu0 }
 0x10f   :  { %v1911_v61 = vpop.f32.mrf.mxu0 }
 0x110   :  { %v1912_v2 = vadd.f32 %v1911_v61, %v1910_v18 }
 0x112   :  { %v558_v37 = vadd.f32 %v1912_v2, %v420_v17 }
 0x116   :  { %v1945_v11 = vpop.f32.mrf.mxu1 }
 0x118   :  { %v1946_v34 = vpop.f32.mrf.mxu1 }
 0x119   :  { %v1947_v51 = vadd.f32 %v1946_v34, %v1945_v11 }
 0x11b   :  { %v666_v27 = vadd.f32 %v1947_v51, %v558_v37 }
 0x130   :  { %v1980_v53 = vpop.f32.mrf.mxu0 }
 0x132   :  { %v1981_v56 = vpop.f32.mrf.mxu0 }
 0x133   :  { %v1982_v29 = vadd.f32 %v1981_v56, %v1980_v53 }
 0x135   :  { %v834_v50 = vadd.f32 %v1982_v29, %v666_v27 }
 0x138   :  { %v2015_v22 = vpop.f32.mrf.mxu1 }
 0x13a   :  { %v2016_v7 = vpop.f32.mrf.mxu1 }
 0x13b   :  { %v2017_v52 = vadd.f32 %v2016_v7, %v2015_v22 }
 0x13d   :  { %v938_v25 = vadd.f32 %v2017_v52, %v834_v50 }
 0x152   :  { %v2050_v54 = vpop.f32.mrf.mxu0 }
 0x154   :  { %v2051_v33 = vpop.f32.mrf.mxu0 }
 0x155   :  { %v2052_v62 = vadd.f32 %v2051_v33, %v2050_v54 }
 0x157   :  { %v1050_v8 = vadd.f32 %v2052_v62, %v938_v25 }
 0x15c   :  { %v2085_v20 = vpop.f32.mrf.mxu1 }
 0x15e   :  { %v2086_v15 = vpop.f32.mrf.mxu1 }
 0x15f   :  { %v2087_v14 = vadd.f32 %v2086_v15, %v2085_v20 }
 0x161   :  { %v1282_v42 = vadd.f32 %v2087_v14, %v1050_v8 }
 0x174   :  { %v2120_v32 = vpop.f32.mrf.mxu0 }
 0x176   :  { %v2121_v19 = vpop.f32.mrf.mxu0 }
 0x177   :  { %v2122_v43 = vadd.f32 %v2121_v19, %v2120_v32 }
 0x179   :  { %v1420_v28 = vadd.f32 %v2122_v43, %v1282_v42 }
 0x17d   :  { %v2155_v24 = vpop.f32.mrf.mxu1 }
 0x17f   :  { %v2156_v1 = vpop.f32.mrf.mxu1 }
 0x180   :  { %v2157_v55 = vadd.f32 %v2156_v1, %v2155_v24 }
 0x182   :  { %v1528_v21 = vadd.f32 %v2157_v55, %v1420_v28 }
 0x196   :  { %v2190_v31 = vpop.f32.mrf.mxu0 }
 0x198   :  { %v2191_v30 = vpop.f32.mrf.mxu0 }
 0x199   :  { %v2192_v16 = vadd.f32 %v2191_v30, %v2190_v31 }
 0x19b   :  { %v1696_v0 = vadd.f32 %v2192_v16, %v1528_v21 }
 0x19f   :  { %v2225_v63 = vpop.f32.mrf.mxu1 }
 0x1a1   :  { %v2226_v49 = vpop.f32.mrf.mxu1 }
 0x1a2   :  { %v2227_v41 = vadd.f32 %v2226_v49, %v2225_v63 }
 0x1a4   :  { %v1800_v40 = vadd.f32 %v2227_v41, %v1696_v0 }
 0x1a6   :  { %1803 = vst [vmem:[%s3633_s2] sm:$0xff] %v1800_v40 }

</bundles_post_ra>
